<compile_context>
chip_gen: v7x
topology: tpu7x:2x2x1
jax: 0.10.0
libtpu: 0.0.40
codegen_flags: <defaults>
</compile_context>

<pallas_src>
import jax
import jax.numpy as jnp
from jax.experimental import pallas as pl
from jax.experimental.pallas import tpu as pltpu


def _make_channel_attention_kernel(HW, THW, lane, n_sub, needs_mask):
    """Builds the kernel for fixed static tiling parameters."""
    inv_hw = 1.0 / float(HW)

    def kernel(x_ref, w1_ref, w2_ref, o_ref, sum_acc, max_acc):
        # x_ref: (TB, C, THW)  w1_ref: (C, Cr)  w2_ref: (Cr, C)  o_ref: (TB, C)
        # sum_acc / max_acc: (TB, C, lane) f32 running accumulators.
        k = pl.program_id(1)

        @pl.when(k == 0)
        def _():
            sum_acc[...] = jnp.zeros(sum_acc.shape, sum_acc.dtype)
            max_acc[...] = jnp.full(max_acc.shape, -jnp.inf, max_acc.dtype)

        s = sum_acc[...]
        m = max_acc[...]
        if needs_mask:
            lane_idx = jax.lax.broadcasted_iota(jnp.int32, s.shape, 2)
            base = k * THW
        # Pure-VPU accumulation over 128-lane sub-slices of this HW chunk; the
        # expensive cross-lane reduce happens only once, in the finalize step.
        for j in range(n_sub):
            chunk = x_ref[:, :, j * lane:(j + 1) * lane].astype(jnp.float32)
            if needs_mask:
                valid = (base + j * lane + lane_idx) < HW
                s = s + jnp.where(valid, chunk, 0.0)
                m = jnp.maximum(m, jnp.where(valid, chunk, -jnp.inf))
            else:
                s = s + chunk
                m = jnp.maximum(m, chunk)
        sum_acc[...] = s
        max_acc[...] = m

        @pl.when(k == pl.num_programs(1) - 1)
        def _():
            avg = jnp.sum(sum_acc[...], axis=-1) * jnp.float32(inv_hw)   # (TB, C)
            mx = jnp.max(max_acc[...], axis=-1)                          # (TB, C)
            tb = avg.shape[0]
            # Shared 1x1-conv MLP (no biases), run once on [avg; max].
            v = jnp.concatenate([avg, mx], axis=0)                       # (2*TB, C)
            h = jnp.maximum(
                jnp.dot(v, w1_ref[...], preferred_element_type=jnp.float32), 0.0)
            y = jnp.dot(h, w2_ref[...], preferred_element_type=jnp.float32)
            out = y[:tb] + y[tb:]
            o_ref[...] = jax.nn.sigmoid(out).astype(o_ref.dtype)

    return kernel


def channel_attention_forward(x, w1, w2, *, vmem_budget_bytes=24 << 20,
                              block_hw=None):
    """x: (B, C, H, W) f32 or bf16; w1: (C, C//r) f32; w2: (C//r, C) f32.

    Returns sigmoid(fc(avg_pool(x)) + fc(max_pool(x))) with shape (B, C, 1, 1), f32.

    vmem_budget_bytes: target for the double-buffered x tile (keep well under the
    per-generation scoped VMEM: v5e default 16 MiB, v6e/v7x 32 MiB, v7x physical 64).
    block_hw: optional explicit HW chunk (multiple of 128, or the full H*W).
    """
    B, C, H, W = x.shape
    HW = H * W
    Cr = w1.shape[1]
    assert w1.shape == (C, Cr) and w2.shape == (Cr, C)
    elem = x.dtype.itemsize

    # Free reshape (collapses the two trailing dims): spatial on lanes.
    x3 = x.reshape(B, C, HW)

    # ---- batch tile: multiple of 8 (sublane rule) or the full (small) batch ----
    if B <= 8:
        TB = B                                   # single tile == full batch
    else:
        TB = max(8, ((B // 2) // 8) * 8)         # >= 2 "parallel" tiles when B > 8

    # ---- HW tile: multiple of 128 lanes (or the whole axis if HW < 128) ----
    lane = HW if HW < 128 else 128
    if block_hw is not None:
        THW = int(block_hw)
        assert THW % lane == 0 and THW >= lane
    else:
        units_total = max(1, HW // lane)
        budget_units = max(1, vmem_budget_bytes // (2 * TB * C * lane * elem))
        THW = lane * max(1, min(units_total, budget_units, 32))
    n_sub = THW // lane

    num_b = pl.cdiv(B, TB)
    num_hw = pl.cdiv(HW, THW)
    needs_mask = num_hw * THW > HW               # ragged last HW tile -> mask in-kernel

    kernel = _make_channel_attention_kernel(HW, THW, lane, n_sub, needs_mask)

    # Explicit VMEM accounting (double-buffered x tile dominates).
    x_tile_bytes = TB * C * THW * elem
    scratch_bytes = 2 * TB * C * lane * 4
    w_bytes = (C * Cr + Cr * C) * 4
    out_bytes = TB * C * 4
    vmem_needed = 2 * x_tile_bytes + scratch_bytes + 2 * w_bytes + 2 * out_bytes
    vmem_limit = int(min(64 << 20, max(vmem_needed + (2 << 20), 16 << 20)))

    out = pl.pallas_call(
        kernel,
        out_shape=jax.ShapeDtypeStruct((B, C), jnp.float32),
        grid_spec=pltpu.PrefetchScalarGridSpec(
            num_scalar_prefetch=0,
            grid=(num_b, num_hw),
            in_specs=[
                # x streams per (batch tile, HW chunk).
                pl.BlockSpec((TB, C, THW), lambda i, k: (i, 0, k)),
                # Weights: constant index_map -> DMA'd once, VMEM-resident.
                pl.BlockSpec((C, Cr), lambda i, k: (0, 0)),
                pl.BlockSpec((Cr, C), lambda i, k: (0, 0)),
            ],
            # Constant in k -> output block is accumulator-resident across the
            # HW reduction; lane-dense (C on lanes) stores.
            out_specs=pl.BlockSpec((TB, C), lambda i, k: (i, 0)),
            scratch_shapes=[
                pltpu.VMEM((TB, C, lane), jnp.float32),   # running sum
                pltpu.VMEM((TB, C, lane), jnp.float32),   # running max
            ],
        ),
        compiler_params=pltpu.CompilerParams(
            # batch tiles independent (v7x: 2 TCs); HW axis is a reduction.
            dimension_semantics=("parallel", "arbitrary"),
            vmem_limit_bytes=vmem_limit,
        ),
        cost_estimate=pl.CostEstimate(
            flops=2 * B * C * HW + 8 * B * C * Cr,
            transcendentals=B * C,
            bytes_accessed=B * C * HW * elem + B * C * 4 + w_bytes,
        ),
    )(x3, w1, w2)

    return out.reshape(B, C, 1, 1)


def init_params(key, channels, reduction=16):
    """Match nn.Conv2d(..., bias=False) default init (kaiming-uniform, a=sqrt(5)).

    Conv1 weight (Cr, C, 1, 1) -> stored transposed as (C, Cr)
    Conv2 weight (C, Cr, 1, 1) -> stored transposed as (Cr, C)
    """
    Cr = channels // reduction
    k1, k2 = jax.random.split(key)
    bound1 = 1.0 / (channels ** 0.5)   # fan_in = C
    bound2 = 1.0 / (Cr ** 0.5)         # fan_in = Cr
    w1 = jax.random.uniform(k1, (channels, Cr), jnp.float32, -bound1, bound1)
    w2 = jax.random.uniform(k2, (Cr, channels), jnp.float32, -bound2, bound2)
    return w1, w2


def _reference(x, w1, w2):
    avg = x.mean(axis=(2, 3))                      # (B, C)
    mx = x.max(axis=(2, 3))                        # (B, C)

    def fc(v):
        return jnp.maximum(v @ w1, 0.0) @ w2

    y = jax.nn.sigmoid(fc(avg) + fc(mx))
    B, C = y.shape
    return y.reshape(B, C, 1, 1)


if __name__ == "__main__":
    B = 2
    C = 128          # channel count = lane width -> lane-dense (B, C) output stores
    H = W = 16       # spatial, H*W = 256
    REDUCTION = 16   # module default -> hidden = 8

    key = jax.random.PRNGKey(0)
    k_x, k_p = jax.random.split(key)
    x = jax.random.normal(k_x, (B, C, H, W), jnp.float32)
    w1, w2 = init_params(k_p, C, REDUCTION)

    ref = _reference(x, w1, w2)

    # Default tiling (single HW step: init + finalize in one grid cell).
    out = jax.block_until_ready(channel_attention_forward(x, w1, w2))
    assert out.shape == (B, C, 1, 1)
    assert jnp.allclose(out, ref, atol=1e-5, rtol=1e-5), "channel-attention mismatch"

    # Forced HW chunking -> exercises the multi-step scratch-accumulator path.
    out2 = jax.block_until_ready(channel_attention_forward(x, w1, w2, block_hw=128))
    assert jnp.allclose(out2, ref, atol=1e-5, rtol=1e-5), "chunked-HW mismatch"

    # bf16 streaming input (half the HBM bytes), f32 accumulation in-kernel.
    x_bf = x.astype(jnp.bfloat16)
    ref_bf = _reference(x_bf.astype(jnp.float32), w1, w2)
    out3 = jax.block_until_ready(
        channel_attention_forward(x_bf, w1, w2, block_hw=128))
    assert jnp.allclose(out3, ref_bf, atol=1e-4, rtol=1e-4), "bf16 mismatch"

    print("KERNEL_OK")
</pallas_src>

<mosaic_0001>
module attributes {stable_mosaic.version = 11 : i64} {
  func.func @kernel(%arg0: i32, %arg1: i32, %arg2: memref<2x128x256xf32, #tpu.memory_space<vmem>>, %arg3: memref<128x8xf32, #tpu.memory_space<vmem>>, %arg4: memref<8x128xf32, #tpu.memory_space<vmem>>, %arg5: memref<2x128xf32, #tpu.memory_space<vmem>>, %arg6: memref<2x128x128xf32, #tpu.memory_space<vmem>>, %arg7: memref<2x128x128xf32, #tpu.memory_space<vmem>>) attributes {dimension_semantics = [#tpu.dimension_semantics<parallel>, #tpu.dimension_semantics<arbitrary>], iteration_bounds = array<i64: 1, 1>, scalar_prefetch = 0 : i64, scratch_operands = 2 : i64, tpu.core_type = #tpu.core_type<tc>, window_params = [{transform_indices = @transform_0, window_bounds = array<i64: 2, 128, 256>}, {pipeline_mode = #tpu.pipeline_mode<synchronous>, transform_indices = @transform_1, window_bounds = array<i64: 128, 8>}, {pipeline_mode = #tpu.pipeline_mode<synchronous>, transform_indices = @transform_2, window_bounds = array<i64: 8, 128>}, {transform_indices = @transform_3, window_bounds = array<i64: 2, 128>}]} {
    %c0_i32 = arith.constant 0 : i32
    %0 = arith.cmpi eq, %arg1, %c0_i32 : i32
    %1 = arith.extui %0 : i1 to i32
    %c0_i32_0 = arith.constant 0 : i32
    %2 = arith.cmpi ne, %1, %c0_i32_0 : i32
    scf.if %2 {
      %cst = arith.constant 0.000000e+00 : f32
      %16 = vector.broadcast %cst : f32 to vector<2x128x128xf32>
      %c0_19 = arith.constant 0 : index
      %c0_20 = arith.constant 0 : index
      %c0_21 = arith.constant 0 : index
      %17 = vector.load %arg6[%c0_19, %c0_20, %c0_21] : memref<2x128x128xf32, #tpu.memory_space<vmem>>, vector<2x128x128xf32>
      tpu.vector_store %arg6[%c0_19, %c0_20, %c0_21], %16 {strides = array<i32>} : memref<2x128x128xf32, #tpu.memory_space<vmem>>, vector<2x128x128xf32>,
      %cst_22 = arith.constant 0xFF800000 : f32
      %18 = vector.broadcast %cst_22 : f32 to vector<2x128x128xf32>
      %c0_23 = arith.constant 0 : index
      %c0_24 = arith.constant 0 : index
      %c0_25 = arith.constant 0 : index
      %19 = vector.load %arg7[%c0_23, %c0_24, %c0_25] : memref<2x128x128xf32, #tpu.memory_space<vmem>>, vector<2x128x128xf32>
      tpu.vector_store %arg7[%c0_23, %c0_24, %c0_25], %18 {strides = array<i32>} : memref<2x128x128xf32, #tpu.memory_space<vmem>>, vector<2x128x128xf32>,
    } else {
    }
    %c0 = arith.constant 0 : index
    %c0_1 = arith.constant 0 : index
    %c0_2 = arith.constant 0 : index
    %3 = vector.load %arg6[%c0, %c0_1, %c0_2] : memref<2x128x128xf32, #tpu.memory_space<vmem>>, vector<2x128x128xf32>
    %c0_3 = arith.constant 0 : index
    %c0_4 = arith.constant 0 : index
    %c0_5 = arith.constant 0 : index
    %4 = vector.load %arg7[%c0_3, %c0_4, %c0_5] : memref<2x128x128xf32, #tpu.memory_space<vmem>>, vector<2x128x128xf32>
    %c0_6 = arith.constant 0 : index
    %c0_7 = arith.constant 0 : index
    %c0_8 = arith.constant 0 : index
    %5 = vector.load %arg2[%c0_6, %c0_7, %c0_8] : memref<2x128x256xf32, #tpu.memory_space<vmem>>, vector<2x128x128xf32>
    %6 = arith.addf %3, %5 : vector<2x128x128xf32>
    %7 = arith.maximumf %4, %5 : vector<2x128x128xf32>
    %c0_9 = arith.constant 0 : index
    %c0_10 = arith.constant 0 : index
    %c128 = arith.constant 128 : index
    %8 = vector.load %arg2[%c0_9, %c0_10, %c128] : memref<2x128x256xf32, #tpu.memory_space<vmem>>, vector<2x128x128xf32>
    %9 = arith.addf %6, %8 : vector<2x128x128xf32>
    %10 = arith.maximumf %7, %8 : vector<2x128x128xf32>
    %c0_11 = arith.constant 0 : index
    %c0_12 = arith.constant 0 : index
    %c0_13 = arith.constant 0 : index
    %11 = vector.load %arg6[%c0_11, %c0_12, %c0_13] : memref<2x128x128xf32, #tpu.memory_space<vmem>>, vector<2x128x128xf32>
    tpu.vector_store %arg6[%c0_11, %c0_12, %c0_13], %9 {strides = array<i32>} : memref<2x128x128xf32, #tpu.memory_space<vmem>>, vector<2x128x128xf32>,
    %c0_14 = arith.constant 0 : index
    %c0_15 = arith.constant 0 : index
    %c0_16 = arith.constant 0 : index
    %12 = vector.load %arg7[%c0_14, %c0_15, %c0_16] : memref<2x128x128xf32, #tpu.memory_space<vmem>>, vector<2x128x128xf32>
    tpu.vector_store %arg7[%c0_14, %c0_15, %c0_16], %10 {strides = array<i32>} : memref<2x128x128xf32, #tpu.memory_space<vmem>>, vector<2x128x128xf32>,
    %c0_i32_17 = arith.constant 0 : i32
    %13 = arith.cmpi eq, %arg1, %c0_i32_17 : i32
    %14 = arith.extui %13 : i1 to i32
    %c0_i32_18 = arith.constant 0 : i32
    %15 = arith.cmpi ne, %14, %c0_i32_18 : i32
    scf.if %15 {
      %c0_19 = arith.constant 0 : index
      %c0_20 = arith.constant 0 : index
      %c0_21 = arith.constant 0 : index
      %16 = vector.load %arg6[%c0_19, %c0_20, %c0_21] : memref<2x128x128xf32, #tpu.memory_space<vmem>>, vector<2x128x128xf32>
      %cst = arith.constant dense<0.000000e+00> : vector<2x128xf32>
      %17 = vector.multi_reduction <add>, %16, %cst [2] : vector<2x128x128xf32> to vector<2x128xf32>
      %cst_22 = arith.constant 3.906250e-03 : f32
      %18 = vector.broadcast %cst_22 : f32 to vector<2x128xf32>
      %19 = arith.mulf %17, %18 : vector<2x128xf32>
      %c0_23 = arith.constant 0 : index
      %c0_24 = arith.constant 0 : index
      %c0_25 = arith.constant 0 : index
      %20 = vector.load %arg7[%c0_23, %c0_24, %c0_25] : memref<2x128x128xf32, #tpu.memory_space<vmem>>, vector<2x128x128xf32>
      %cst_26 = arith.constant dense<0xFF800000> : vector<2x128xf32>
      %21 = vector.multi_reduction <maximumf>, %20, %cst_26 [2] : vector<2x128x128xf32> to vector<2x128xf32>
      %22 = tpu.concatenate %19, %21 in 0 : vector<2x128xf32>, vector<2x128xf32> -> vector<4x128xf32>
      %c0_27 = arith.constant 0 : index
      %c0_28 = arith.constant 0 : index
      %23 = vector.load %arg3[%c0_27, %c0_28] : memref<128x8xf32, #tpu.memory_space<vmem>>, vector<128x8xf32>
      %cst_29 = arith.constant dense<0.000000e+00> : vector<4x8xf32>
      %24 = tpu.matmul %22, %23, %cst_29 {dimension_numbers = #tpu.dot_dimension_numbers<[1], [0], [0], [1], [0, 0, 1, 1], [], []>} : vector<4x128xf32>, vector<128x8xf32>, vector<4x8xf32> -> vector<4x8xf32>
      %cst_30 = arith.constant 0.000000e+00 : f32
      %25 = vector.broadcast %cst_30 : f32 to vector<4x8xf32>
      %26 = arith.maximumf %24, %25 : vector<4x8xf32>
      %c0_31 = arith.constant 0 : index
      %c0_32 = arith.constant 0 : index
      %27 = vector.load %arg4[%c0_31, %c0_32] : memref<8x128xf32, #tpu.memory_space<vmem>>, vector<8x128xf32>
      %cst_33 = arith.constant dense<0.000000e+00> : vector<4x128xf32>
      %28 = tpu.matmul %26, %27, %cst_33 {dimension_numbers = #tpu.dot_dimension_numbers<[1], [0], [0], [1], [0, 0, 1, 1], [], []>} : vector<4x8xf32>, vector<8x128xf32>, vector<4x128xf32> -> vector<4x128xf32>
      %29 = vector.extract_strided_slice %28 {offsets = [0, 0], sizes = [2, 128], strides = [1, 1]} : vector<4x128xf32> to vector<2x128xf32>
      %30 = vector.extract_strided_slice %28 {offsets = [2, 0], sizes = [2, 128], strides = [1, 1]} : vector<4x128xf32> to vector<2x128xf32>
      %31 = arith.addf %29, %30 : vector<2x128xf32>
      %32 = arith.negf %31 : vector<2x128xf32>
      %33 = math.exp %32 : vector<2x128xf32>
      %cst_34 = arith.constant 1.000000e+00 : f32
      %34 = vector.broadcast %cst_34 : f32 to vector<2x128xf32>
      %35 = arith.addf %34, %33 : vector<2x128xf32>
      %36 = arith.divf %34, %35 : vector<2x128xf32>
      %c0_35 = arith.constant 0 : index
      %c0_36 = arith.constant 0 : index
      %37 = vector.load %arg5[%c0_35, %c0_36] : memref<2x128xf32, #tpu.memory_space<vmem>>, vector<2x128xf32>
      tpu.vector_store %arg5[%c0_35, %c0_36], %36 {strides = array<i32>} : memref<2x128xf32, #tpu.memory_space<vmem>>, vector<2x128xf32>,
    } else {
    }
    return
  }
  func.func @transform_0(%arg0: i32, %arg1: i32) -> (i32, i32, i32) {
    %c0_i32 = arith.constant 0 : i32
    %c0_i32_0 = arith.constant 0 : i32
    return %arg0, %c0_i32, %arg1 : i32, i32, i32
  }
  func.func @transform_1(%arg0: i32, %arg1: i32) -> (i32, i32) {
    %c0_i32 = arith.constant 0 : i32
    %c0_i32_0 = arith.constant 0 : i32
    %c0_i32_1 = arith.constant 0 : i32
    return %c0_i32, %c0_i32_0 : i32, i32
  }
  func.func @transform_2(%arg0: i32, %arg1: i32) -> (i32, i32) {
    %c0_i32 = arith.constant 0 : i32
    %c0_i32_0 = arith.constant 0 : i32
    %c0_i32_1 = arith.constant 0 : i32
    return %c0_i32, %c0_i32_0 : i32, i32
  }
  func.func @transform_3(%arg0: i32, %arg1: i32) -> (i32, i32) {
    %c0_i32 = arith.constant 0 : i32
    %c0_i32_0 = arith.constant 0 : i32
    return %arg0, %c0_i32 : i32, i32
  }
}

</mosaic_0001>

<bundles_post_ra>
// kernel: tpu_custom_call.1
= control target key start
LH: loop header
LB: loop body
LE: loop exit
PB: predicated region body
PF: predicated region fallthrough
CT: control target
= control target key end

     0   :  { %8 = vsyncpa [#allocation5], 0  ;;  %s1718_s0 = inlined_call_operand.hbm [shape: f32[2,128,256], index: 0, kind: input, shape index: {}]   ;;  %s1719_s1 = inlined_call_operand.vmem [shape: f32[128,8], index: 1, kind: input, shape index: {}]   ;;  %s1720_s2 = inlined_call_operand.vmem [shape: f32[8,128], index: 2, kind: input, shape index: {}]   ;;  %s1721_s3 = inlined_call_operand.hbm [shape: f32[2,128], index: 3, kind: output, shape index: {}]  }
   0x1   :  { %9 = vsyncpa [#allocation6], 0  ;;  %s1396_s12 = smov [#allocation4]   ;;  %s1348_s16 = scalar_lea.hbm %s1718_s0, 8192 }
   0x2   :  { %s15_s13 = sshll.u32 %s1396_s12, 4  ;;  %p1349_p0 = scmp.ne.s32.totalorder %s1718_s0, %s1348_s16  ;;  %s16_s13 = int_to_ptr.vmem [resolvable:$true] %s15_s13 }
   0x3   :  { %p1352_p1 = scmp.lt.u32.totalorder %s1348_s16, %s1718_s0 }
   0x5   :  { %p1354_p2 = pnand %p1352_p1, %p1349_p0 }
   0x7   :  { %1357 = shalt.err (!%p1354_p2)
}
   0x8   :  { %s1358_s21 = scalar_lea.vmem %s16_s13, 8192  ;;  %p1363_p4 = scmp.lt.s32.totalorder %s16_s13, %s16_s13 }
   0x9   :  { %p1359_p3 = scmp.ne.s32.totalorder %s16_s13, %s1358_s21  ;;  %p1364_p5 = scmp.lt.s32.totalorder %s1358_s21, %s1358_s21 }
   0xb   :  { %p1365_p6 = por %p1364_p5, %p1363_p4 }
   0xd   :  { %p1366_p7 = pnand %p1365_p6, %p1359_p3 }
   0xf   :  { %1369 = shalt.err (!%p1366_p7)
}
  0x10   :  { %s1397_s22 = smov 256   ;;  %s1398_s23 = smov 16  }
  0x11   :  { %21 = dma.hbm_to_vmem [thread:$0]  %s1718_s0, 8192, %s16_s13, [#allocation5], %s1397_s22, %s1397_s22, %s1398_s23  }
  0x12   :  { %1392 = dma.done.wait [#allocation5], 8192  }
  0x13   :  { %1393 = vsyncadd [#allocation5], 4294959104  ;;  %v177_v0 = vld [vmem:[#allocation4 + $0x100] sm:$0xff]  ;;  %v273_v1 = vld [vmem:[#allocation4 + $0x108] sm:$0xff]  ;;  %vm1400_vm0 = vmmov 0   ;;  %vm687_vm1 = vcmask 130112  }
  0x14   :  { %v161_v2 = vld [vmem:[#allocation4] sm:$0xff]  ;;  %v305_v3 = vadd.f32 %v273_v1, %v177_v0  ;;  %v257_v4 = vld [vmem:[#allocation4 + $0x8] sm:$0xff]  ;;  %v178_v5 = vld [vmem:[#allocation4 + $0x110] sm:$0xff]  ;;  %v337_v27 = vmax.f32 %v177_v0, %v273_v1  ;;  %vm694_vm2 = vcmask 195712   ;;  %vm701_vm3 = vcmask 261312   ;;  %s1402_s30 = smov [#allocation7]  }
  0x15   :  { %v274_v6 = vld [vmem:[#allocation4 + $0x118] sm:$0xff]  ;;  %v289_v7 = vadd.f32 %v257_v4, %v161_v2  ;;  %v162_v8 = vld [vmem:[#allocation4 + $0x10] sm:$0xff]  ;;  %v179_v12 = vld [vmem:[#allocation4 + $0x120] sm:$0xff]  ;;  %v321_v25 = vmax.f32 %v161_v2, %v257_v4  ;;  %vm708_vm4 = vcmask 326912   ;;  %vm715_vm5 = vcmask 392512   ;;  %s1243_s4 = sshll.u32 %s1402_s30, 4  ;;  %s1244_s4 = int_to_ptr.vmem [resolvable:$true] %s1243_s4 }
  0x16   :  { %v258_v9 = vld [vmem:[#allocation4 + $0x18] sm:$0xff]  ;;  %484 = vadd.xlane.f32.xlu1 %v305_v3  ;;  %v306_v10 = vadd.f32 %v274_v6, %v178_v5  ;;  %v275_v13 = vld [vmem:[#allocation4 + $0x128] sm:$0xff]  ;;  %v163_v14 = vld [vmem:[#allocation4 + $0x20] sm:$0xff]  ;;  %v338_v26 = vmax.f32 %v178_v5, %v274_v6  ;;  %vm722_vm6 = vcmask 458112   ;;  %vm729_vm7 = vcmask 523712   ;;  %p1375_p9 = scmp.lt.s32.totalorder %s1244_s4, %s1244_s4 }
  0x17   :  { %452 = vadd.xlane.f32.xlu0 %v289_v7  ;;  %v290_v11 = vadd.f32 %v258_v9, %v162_v8  ;;  %v259_v15 = vld [vmem:[#allocation4 + $0x28] sm:$0xff]  ;;  %v307_v16 = vadd.f32 %v275_v13, %v179_v12  ;;  %v180_v18 = vld [vmem:[#allocation4 + $0x130] sm:$0xff]  ;;  %v276_v19 = vld [vmem:[#allocation4 + $0x138] sm:$0xff]  ;;  %v322_v24 = vmax.f32 %v162_v8, %v258_v9  ;;  %v339_v34 = vmax.f32 %v179_v12, %v275_v13 }
  0x18   :  { %v291_v17 = vadd.f32 %v259_v15, %v163_v14  ;;  %v164_v20 = vld [vmem:[#allocation4 + $0x30] sm:$0xff]  ;;  %v260_v21 = vld [vmem:[#allocation4 + $0x38] sm:$0xff]  ;;  %v308_v22 = vadd.f32 %v276_v19, %v180_v18  ;;  %v181_v28 = vld [vmem:[#allocation4 + $0x140] sm:$0xff]  ;;  %v323_v35 = vmax.f32 %v163_v14, %v259_v15  ;;  %v340_v42 = vmax.f32 %v180_v18, %v276_v19 }
  0x19   :  { %v292_v23 = vadd.f32 %v260_v21, %v164_v20  ;;  %v277_v29 = vld [vmem:[#allocation4 + $0x148] sm:$0xff]  ;;  %v165_v30 = vld [vmem:[#allocation4 + $0x40] sm:$0xff]  ;;  %v182_v36 = vld [vmem:[#allocation4 + $0x150] sm:$0xff]  ;;  %v324_v43 = vmax.f32 %v164_v20, %v260_v21  ;;  %vm736_vm8 = vcmask 589312   ;;  %vm743_vm9 = vcmask 654912  }
  0x1a   :  { %486 = vadd.xlane.f32.xlu1 %v306_v10  ;;  %v261_v31 = vld [vmem:[#allocation4 + $0x48] sm:$0xff]  ;;  %v309_v32 = vadd.f32 %v277_v29, %v181_v28  ;;  %v278_v37 = vld [vmem:[#allocation4 + $0x158] sm:$0xff]  ;;  %v166_v38 = vld [vmem:[#allocation4 + $0x50] sm:$0xff]  ;;  %v341_v50 = vmax.f32 %v181_v28, %v277_v29  ;;  %vm750_vm10 = vcmask 720512   ;;  %vm757_vm11 = vcmask 786112  }
  0x1b   :  { %454 = vadd.xlane.f32.xlu0 %v290_v11  ;;  %v293_v33 = vadd.f32 %v261_v31, %v165_v30  ;;  %v262_v39 = vld [vmem:[#allocation4 + $0x58] sm:$0xff]  ;;  %v310_v40 = vadd.f32 %v278_v37, %v182_v36  ;;  %v183_v44 = vld [vmem:[#allocation4 + $0x160] sm:$0xff]  ;;  %v279_v45 = vld [vmem:[#allocation4 + $0x168] sm:$0xff]  ;;  %v325_v51 = vmax.f32 %v165_v30, %v261_v31  ;;  %v342_v58 = vmax.f32 %v182_v36, %v278_v37 }
  0x1c   :  { %v294_v41 = vadd.f32 %v262_v39, %v166_v38  ;;  %v167_v46 = vld [vmem:[#allocation4 + $0x60] sm:$0xff]  ;;  %v263_v47 = vld [vmem:[#allocation4 + $0x68] sm:$0xff]  ;;  %v311_v48 = vadd.f32 %v279_v45, %v183_v44  ;;  %v184_v52 = vld [vmem:[#allocation4 + $0x170] sm:$0xff]  ;;  %v326_v59 = vmax.f32 %v166_v38, %v262_v39  ;;  %v343_v2 = vmax.f32 %v183_v44, %v279_v45 }
  0x1d   :  { %v295_v49 = vadd.f32 %v263_v47, %v167_v46  ;;  %v280_v53 = vld [vmem:[#allocation4 + $0x178] sm:$0xff]  ;;  %v168_v54 = vld [vmem:[#allocation4 + $0x70] sm:$0xff]  ;;  %v185_v60 = vld [vmem:[#allocation4 + $0x180] sm:$0xff]  ;;  %v327_v3 = vmax.f32 %v167_v46, %v263_v47  ;;  %vm764_vm12 = vcmask 851712   ;;  %vm771_vm13 = vcmask 917312  }
  0x1e   :  { %488 = vadd.xlane.f32.xlu1 %v307_v16  ;;  %v264_v55 = vld [vmem:[#allocation4 + $0x78] sm:$0xff]  ;;  %v312_v56 = vadd.f32 %v280_v53, %v184_v52  ;;  %v281_v61 = vld [vmem:[#allocation4 + $0x188] sm:$0xff]  ;;  %v169_v62 = vld [vmem:[#allocation4 + $0x80] sm:$0xff]  ;;  %v344_v10 = vmax.f32 %v184_v52, %v280_v53  ;;  %vm778_vm14 = vcmask 982912   ;;  %vm785_vm15 = vcmask 1048512  }
  0x1f   :  { %456 = vadd.xlane.f32.xlu0 %v291_v17  ;;  %v296_v57 = vadd.f32 %v264_v55, %v168_v54  ;;  %v265_v63 = vld [vmem:[#allocation4 + $0x88] sm:$0xff]  ;;  %v313_v0 = vadd.f32 %v281_v61, %v185_v60  ;;  %v186_v4 = vld [vmem:[#allocation4 + $0x190] sm:$0xff]  ;;  %v282_v5 = vld [vmem:[#allocation4 + $0x198] sm:$0xff]  ;;  %v328_v11 = vmax.f32 %v168_v54, %v264_v55  ;;  %v345_v18 = vmax.f32 %v185_v60, %v281_v61 }
  0x20   :  { %v297_v1 = vadd.f32 %v265_v63, %v169_v62  ;;  %v170_v6 = vld [vmem:[#allocation4 + $0x90] sm:$0xff]  ;;  %v266_v7 = vld [vmem:[#allocation4 + $0x98] sm:$0xff]  ;;  %v314_v8 = vadd.f32 %v282_v5, %v186_v4  ;;  %v187_v12 = vld [vmem:[#allocation4 + $0x1a0] sm:$0xff]  ;;  %v329_v19 = vmax.f32 %v169_v62, %v265_v63  ;;  %v1399_v62 = vmov 0.0|0.0  }
  0x21   :  { %v298_v9 = vadd.f32 %v266_v7, %v170_v6  ;;  %v283_v13 = vld [vmem:[#allocation4 + $0x1a8] sm:$0xff]  ;;  %v171_v14 = vld [vmem:[#allocation4 + $0xa0] sm:$0xff]  ;;  %v188_v20 = vld [vmem:[#allocation4 + $0x1b0] sm:$0xff]  ;;  %1313 = vmatprep.subr.bf16.mxu0 %v1399_v62 }
  0x22   :  { %490 = vadd.xlane.f32.xlu1 %v308_v22  ;;  %v267_v15 = vld [vmem:[#allocation4 + $0xa8] sm:$0xff]  ;;  %v315_v16 = vadd.f32 %v283_v13, %v187_v12  ;;  %v284_v21 = vld [vmem:[#allocation4 + $0x1b8] sm:$0xff]  ;;  %v172_v22 = vld [vmem:[#allocation4 + $0xb0] sm:$0xff] }
  0x23   :  { %458 = vadd.xlane.f32.xlu0 %v292_v23  ;;  %v299_v17 = vadd.f32 %v267_v15, %v171_v14  ;;  %v268_v23 = vld [vmem:[#allocation4 + $0xb8] sm:$0xff]  ;;  %v189_v28 = vld [vmem:[#allocation4 + $0x1c0] sm:$0xff]  ;;  %v285_v29 = vld [vmem:[#allocation4 + $0x1c8] sm:$0xff] }
  0x24   :  { %v173_v30 = vld [vmem:[#allocation4 + $0xc0] sm:$0xff]  ;;  %v269_v31 = vld [vmem:[#allocation4 + $0xc8] sm:$0xff]  ;;  %v190_v36 = vld [vmem:[#allocation4 + $0x1d0] sm:$0xff] }
  0x25   :  { %v286_v37 = vld [vmem:[#allocation4 + $0x1d8] sm:$0xff]  ;;  %v174_v38 = vld [vmem:[#allocation4 + $0xd0] sm:$0xff]  ;;  %v191_v44 = vld [vmem:[#allocation4 + $0x1e0] sm:$0xff] }
  0x26   :  { %582 = vmax.xlane.f32.xlu1 %v322_v24  ;;  %v316_v24 = vadd.f32 %v284_v21, %v188_v20  ;;  %v270_v39 = vld [vmem:[#allocation4 + $0xd8] sm:$0xff]  ;;  %v287_v45 = vld [vmem:[#allocation4 + $0x1e8] sm:$0xff]  ;;  %v175_v46 = vld [vmem:[#allocation4 + $0xe0] sm:$0xff]  ;;  %v350_v61 = vmax.f32 %v190_v36, %v286_v37 }
  0x27   :  { %580 = vmax.xlane.f32.xlu0 %v321_v25  ;;  %v300_v25 = vadd.f32 %v268_v23, %v172_v22  ;;  %v271_v47 = vld [vmem:[#allocation4 + $0xe8] sm:$0xff]  ;;  %v192_v52 = vld [vmem:[#allocation4 + $0x1f0] sm:$0xff]  ;;  %v288_v53 = vld [vmem:[#allocation4 + $0x1f8] sm:$0xff]  ;;  %v334_v63 = vmax.f32 %v174_v38, %v270_v39 }
  0x28   :  { %v176_v54 = vld [vmem:[#allocation4 + $0xf0] sm:$0xff]  ;;  %v272_v55 = vld [vmem:[#allocation4 + $0xf8] sm:$0xff] }
  0x2a   :  { %614 = vmax.xlane.f32.xlu1 %v338_v26  ;;  %v346_v26 = vmax.f32 %v186_v4, %v282_v5  ;;  %v335_v4 = vmax.f32 %v175_v46, %v271_v47  ;;  %v1068_v5 = vld [vmem:[%s1719_s1 + $0x20] sm:$0xff] }
  0x2b   :  { %612 = vmax.xlane.f32.xlu0 %v337_v27  ;;  %v330_v27 = vmax.f32 %v170_v6, %v266_v7  ;;  %v1069_v6 = vld [vmem:[%s1719_s1 + $0x28] sm:$0xff] }
  0x2c   :  { %v1320_v7 = vpack.c.bf16 %v1069_v6, %v1068_v5 }
  0x2e   :  { %492 = vadd.xlane.f32.xlu1 %v309_v32  ;;  %v317_v32 = vadd.f32 %v285_v29, %v189_v28 }
  0x2f   :  { %460 = vadd.xlane.f32.xlu0 %v293_v33  ;;  %v301_v33 = vadd.f32 %v269_v31, %v173_v30 }
  0x32   :  { %616 = vmax.xlane.f32.xlu1 %v339_v34  ;;  %v347_v34 = vmax.f32 %v187_v12, %v283_v13  ;;  %v1072_v13 = vld [vmem:[%s1719_s1 + $0x40] sm:$0xff] }
  0x33   :  { %584 = vmax.xlane.f32.xlu0 %v323_v35  ;;  %v331_v35 = vmax.f32 %v171_v14, %v267_v15  ;;  %v1073_v14 = vld [vmem:[%s1719_s1 + $0x48] sm:$0xff] }
  0x34   :  { %v1326_v15 = vpack.c.bf16 %v1073_v14, %v1072_v13 }
  0x36   :  { %494 = vadd.xlane.f32.xlu1 %v310_v40  ;;  %v318_v40 = vadd.f32 %v286_v37, %v190_v36 }
  0x37   :  { %462 = vadd.xlane.f32.xlu0 %v294_v41  ;;  %v302_v41 = vadd.f32 %v270_v39, %v174_v38 }
  0x3a   :  { %618 = vmax.xlane.f32.xlu1 %v340_v42  ;;  %v348_v42 = vmax.f32 %v188_v20, %v284_v21  ;;  %v1076_v20 = vld [vmem:[%s1719_s1 + $0x60] sm:$0xff]  ;;  %v1077_v21 = vld [vmem:[%s1719_s1 + $0x68] sm:$0xff] }
  0x3b   :  { %586 = vmax.xlane.f32.xlu0 %v324_v43  ;;  %v332_v43 = vmax.f32 %v172_v22, %v268_v23  ;;  %v1332_v22 = vpack.c.bf16 %v1077_v21, %v1076_v20 }
  0x3e   :  { %496 = vadd.xlane.f32.xlu1 %v311_v48  ;;  %v319_v48 = vadd.f32 %v287_v45, %v191_v44 }
  0x3f   :  { %464 = vadd.xlane.f32.xlu0 %v295_v49  ;;  %v303_v49 = vadd.f32 %v271_v47, %v175_v46 }
  0x42   :  { %620 = vmax.xlane.f32.xlu1 %v341_v50  ;;  %v349_v50 = vmax.f32 %v189_v28, %v285_v29 }
  0x43   :  { %588 = vmax.xlane.f32.xlu0 %v325_v51  ;;  %v333_v51 = vmax.f32 %v173_v30, %v269_v31  ;;  %v1401_v31 = vmov 0.0  }
  0x44   :  { %1305 = vmatprep.mubr.msk.f32.mxu0 %vm1400_vm0, %v1401_v31  ;;  %1308 = vmatprep.subr.mxu1 %v1401_v31 }
  0x45   :  { %1310 = vmatprep.mubr.msk.f32.mxu1 %vm1400_vm0, %v1401_v31  ;;  %vm866_vm0 = vcmask 1041409  }
  0x46   :  { %498 = vadd.xlane.f32.xlu1 %v312_v56  ;;  %v320_v56 = vadd.f32 %v288_v53, %v192_v52 }
  0x47   :  { %466 = vadd.xlane.f32.xlu0 %v296_v57  ;;  %v304_v57 = vadd.f32 %v272_v55, %v176_v54 }
  0x4a   :  { %622 = vmax.xlane.f32.xlu1 %v342_v58  ;;  %v1064_v58 = vld [vmem:[%s1719_s1] sm:$0xff] }
  0x4b   :  { %590 = vmax.xlane.f32.xlu0 %v326_v59  ;;  %v1065_v59 = vld [vmem:[%s1719_s1 + $0x8] sm:$0xff] }
  0x4c   :  { %v1314_v60 = vpack.c.bf16 %v1065_v59, %v1064_v58 }
  0x4e   :  { %500 = vadd.xlane.f32.xlu1 %v313_v0  ;;  %1315 = vmatpush3.bf16.msra.mxu0 %v1314_v60  ;;  %v1066_v0 = vld [vmem:[%s1719_s1 + $0x10] sm:$0xff] }
  0x4f   :  { %468 = vadd.xlane.f32.xlu0 %v297_v1  ;;  %1316 = vmatprep.subr.bf16.mxu0 %v1399_v62  ;;  %v1067_v1 = vld [vmem:[%s1719_s1 + $0x18] sm:$0xff] }
  0x52   :  { %624 = vmax.xlane.f32.xlu1 %v343_v2  ;;  %v1317_v2 = vpack.c.bf16 %v1067_v1, %v1066_v0 }
  0x53   :  { %592 = vmax.xlane.f32.xlu0 %v327_v3  ;;  %v351_v3 = vmax.f32 %v191_v44, %v287_v45 }
  0x54   :  { %1318 = vmatpush3.bf16.msra.mxu0 %v1317_v2 }
  0x55   :  { %1319 = vmatprep.subr.bf16.mxu0 %v1399_v62 }
  0x56   :  { %502 = vadd.xlane.f32.xlu1 %v314_v8  ;;  %v352_v8 = vmax.f32 %v192_v52, %v288_v53 }
  0x57   :  { %470 = vadd.xlane.f32.xlu0 %v298_v9  ;;  %v336_v9 = vmax.f32 %v176_v54, %v272_v55 }
  0x58   :  { %1321 = vmatpush3.bf16.msra.mxu0 %v1320_v7 }
  0x59   :  { %1322 = vmatprep.subr.bf16.mxu0 %v1399_v62 }
  0x5a   :  { %626 = vmax.xlane.f32.xlu1 %v344_v10  ;;  %v1070_v10 = vld [vmem:[%s1719_s1 + $0x30] sm:$0xff] }
  0x5b   :  { %594 = vmax.xlane.f32.xlu0 %v328_v11  ;;  %v1071_v11 = vld [vmem:[%s1719_s1 + $0x38] sm:$0xff] }
  0x5c   :  { %v1323_v12 = vpack.c.bf16 %v1071_v11, %v1070_v10 }
  0x5e   :  { %504 = vadd.xlane.f32.xlu1 %v315_v16  ;;  %1324 = vmatpush3.bf16.msra.mxu0 %v1323_v12  ;;  %v1074_v16 = vld [vmem:[%s1719_s1 + $0x50] sm:$0xff] }
  0x5f   :  { %472 = vadd.xlane.f32.xlu0 %v299_v17  ;;  %1325 = vmatprep.subr.bf16.mxu0 %v1399_v62  ;;  %v1075_v17 = vld [vmem:[%s1719_s1 + $0x58] sm:$0xff] }
  0x62   :  { %628 = vmax.xlane.f32.xlu1 %v345_v18  ;;  %1327 = vmatpush3.bf16.msra.mxu0 %v1326_v15  ;;  %v1329_v18 = vpack.c.bf16 %v1075_v17, %v1074_v16 }
  0x63   :  { %596 = vmax.xlane.f32.xlu0 %v329_v19  ;;  %1328 = vmatprep.subr.bf16.mxu0 %v1399_v62  ;;  %v676_v19 = vlaneseq }
  0x65   :  { %v1477_v23 = vand.u32 127, %v676_v19 }
  0x66   :  { %506 = vadd.xlane.f32.xlu1 %v316_v24  ;;  %1330 = vmatpush3.bf16.msra.mxu0 %v1329_v18  ;;  %v1078_v24 = vld [vmem:[%s1719_s1 + $0x70] sm:$0xff] }
  0x67   :  { %474 = vadd.xlane.f32.xlu0 %v300_v25  ;;  %1331 = vmatprep.subr.bf16.mxu0 %v1399_v62  ;;  %v1079_v25 = vld [vmem:[%s1719_s1 + $0x78] sm:$0xff]  ;;  %v682_v28 = vadd.s32 4294967288, %v1477_v23  ;;  %v696_v44 = vadd.s32 4294967272, %v1477_v23  ;;  %v703_v6 = vadd.s32 4294967264, %v1477_v23 }
  0x6a   :  { %630 = vmax.xlane.f32.xlu1 %v346_v26  ;;  %1333 = vmatpush3.bf16.msra.mxu0 %v1332_v22  ;;  %v1335_v26 = vpack.c.bf16 %v1079_v25, %v1078_v24 }
  0x6b   :  { %598 = vmax.xlane.f32.xlu0 %v330_v27  ;;  %1334 = vmatprep.subr.bf16.mxu0 %v1399_v62  ;;  %v1485_v27 = vshrl.u32 %v676_v19, 7  ;;  %v710_v19 = vadd.s32 4294967256, %v1477_v23 }
  0x6d   :  { %v699_v54 = vsub.s32 %v696_v44, %v1485_v27  ;;  %v706_v12 = vsub.s32 %v703_v6, %v1485_v27 }
  0x6e   :  { %508 = vadd.xlane.f32.xlu1 %v317_v32  ;;  %1336 = vmatpush3.bf16.msra.mxu0 %v1335_v26  ;;  %v680_v32 = vsub.s32 %v1477_v23, %v1485_v27 }
  0x6f   :  { %476 = vadd.xlane.f32.xlu0 %v301_v33 }
  0x72   :  { %632 = vmax.xlane.f32.xlu1 %v347_v34  ;;  %v685_v34 = vsub.s32 %v682_v28, %v1485_v27 }
  0x73   :  { %600 = vmax.xlane.f32.xlu0 %v331_v35  ;;  %v689_v35 = vadd.s32 4294967280, %v1477_v23 }
  0x76   :  { %510 = vadd.xlane.f32.xlu1 %v318_v40 }
  0x77   :  { %478 = vadd.xlane.f32.xlu0 %v302_v41 }
  0x7a   :  { %634 = vmax.xlane.f32.xlu1 %v348_v42 }
  0x7b   :  { %602 = vmax.xlane.f32.xlu0 %v332_v43  ;;  %v692_v43 = vsub.s32 %v689_v35, %v1485_v27 }
  0x7e   :  { %512 = vadd.xlane.f32.xlu1 %v319_v48 }
  0x7f   :  { %480 = vadd.xlane.f32.xlu0 %v303_v49 }
  0x82   :  { %636 = vmax.xlane.f32.xlu1 %v349_v50 }
  0x83   :  { %604 = vmax.xlane.f32.xlu0 %v333_v51 }
  0x86   :  { %514 = vadd.xlane.f32.xlu1 %v320_v56 }
  0x87   :  { %482 = vadd.xlane.f32.xlu0 %v304_v57 }
  0x8a   :  { %638 = vmax.xlane.f32.xlu1 %v350_v61 }
  0x8b   :  { %606 = vmax.xlane.f32.xlu0 %v334_v63 }
  0x8e   :  { %640 = vmax.xlane.f32.xlu1 %v351_v3 }
  0x8f   :  { %608 = vmax.xlane.f32.xlu0 %v335_v4 }
  0x92   :  { %642 = vmax.xlane.f32.xlu1 %v352_v8 }
  0x93   :  { %610 = vmax.xlane.f32.xlu0 %v336_v9 }
  0xa3   :  { %v485_v29 = vpop.xlane.xlu1 %484 }
  0xa4   :  { %v453_v30 = vpop.xlane.xlu0 %452  ;;  %v532_v33 = vmul.f32 0.00390625, %v485_v29 }
  0xa5   :  { %v516_v36 = vmul.f32 0.00390625, %v453_v30  ;;  %v1510_v30 = vsub.s32 %v710_v19, %v1485_v27 }
  0xa6   :  { %v790_v41 = vrot.slane %v532_v33, %v680_v32 }
  0xa7   :  { %v487_v37 = vpop.xlane.xlu1 %486  ;;  %v681_v45 = vrot.slane %v516_v36, %v680_v32 }
  0xa8   :  { %v533_v38 = vmul.f32 0.00390625, %v487_v37  ;;  %v455_v39 = vpop.xlane.xlu0 %454  ;;  %v717_v37 = vadd.s32 4294967248, %v1477_v23 }
  0xa9   :  { %v517_v40 = vmul.f32 0.00390625, %v455_v39 }
  0xaa   :  { %v794_v42 = vrot.slane %v533_v38, %v685_v34 }
  0xab   :  { %v686_v46 = vrot.slane %v517_v40, %v685_v34  ;;  %v489_v47 = vpop.xlane.xlu1 %488 }
  0xac   :  { %v795_v48 = vsel %vm687_vm1, %v794_v42, %v790_v41  ;;  %v534_v49 = vmul.f32 0.00390625, %v489_v47  ;;  %v457_v50 = vpop.xlane.xlu0 %456 }
  0xad   :  { %v688_v51 = vsel %vm687_vm1, %v686_v46, %v681_v45  ;;  %v518_v52 = vmul.f32 0.00390625, %v457_v50  ;;  %v1520_v46 = vsub.s32 %v717_v37, %v1485_v27 }
  0xae   :  { %v799_v53 = vrot.slane %v534_v49, %v692_v43 }
  0xaf   :  { %v693_v55 = vrot.slane %v518_v52, %v692_v43  ;;  %v491_v56 = vpop.xlane.xlu1 %490 }
  0xb0   :  { %v800_v57 = vsel %vm694_vm2, %v799_v53, %v795_v48  ;;  %v535_v58 = vmul.f32 0.00390625, %v491_v56  ;;  %v459_v59 = vpop.xlane.xlu0 %458  ;;  %v724_v53 = vadd.s32 4294967240, %v1477_v23 }
  0xb1   :  { %v695_v60 = vsel %vm694_vm2, %v693_v55, %v688_v51  ;;  %v519_v61 = vmul.f32 0.00390625, %v459_v59 }
  0xb2   :  { %v804_v62 = vrot.slane %v535_v58, %v699_v54 }
  0xb3   :  { %v700_v63 = vrot.slane %v519_v61, %v699_v54  ;;  %v583_v0 = vpop.xlane.xlu1 %582 }
  0xb4   :  { %v805_v1 = vsel %vm701_vm3, %v804_v62, %v800_v57  ;;  %v908_v2 = vrot.slane %v583_v0, %v685_v34  ;;  %v581_v3 = vpop.xlane.xlu0 %580  ;;  %v1532_v62 = vsub.s32 %v724_v53, %v1485_v27 }
  0xb5   :  { %v702_v4 = vsel %vm701_vm3, %v700_v63, %v695_v60  ;;  %v904_v5 = vrot.slane %v581_v3, %v680_v32 }
  0xb7   :  { %v909_v7 = vsel %vm687_vm1, %v908_v2, %v904_v5  ;;  %v615_v8 = vpop.xlane.xlu1 %614 }
  0xb8   :  { %v987_v9 = vrot.slane %v615_v8, %v685_v34  ;;  %v613_v10 = vpop.xlane.xlu0 %612 }
  0xb9   :  { %v983_v11 = vrot.slane %v613_v10, %v680_v32 }
  0xbb   :  { %v988_v13 = vsel %vm687_vm1, %v987_v9, %v983_v11  ;;  %v493_v14 = vpop.xlane.xlu1 %492  ;;  %vm1059_vm1 = vcmask 1043459  }
  0xbc   :  { %v536_v15 = vmul.f32 0.00390625, %v493_v14  ;;  %v461_v16 = vpop.xlane.xlu0 %460 }
  0xbd   :  { %v520_v17 = vmul.f32 0.00390625, %v461_v16 }
  0xbe   :  { %v809_v18 = vrot.slane %v536_v15, %v706_v12 }
  0xbf   :  { %v707_v20 = vrot.slane %v520_v17, %v706_v12  ;;  %v617_v21 = vpop.xlane.xlu1 %616 }
  0xc0   :  { %v810_v22 = vsel %vm708_vm4, %v809_v18, %v805_v1  ;;  %v992_v24 = vrot.slane %v617_v21, %v692_v43  ;;  %v585_v25 = vpop.xlane.xlu0 %584 }
  0xc1   :  { %v709_v26 = vsel %vm708_vm4, %v707_v20, %v702_v4  ;;  %v913_v28 = vrot.slane %v585_v25, %v692_v43 }
  0xc2   :  { %v993_v29 = vsel %vm694_vm2, %v992_v24, %v988_v13 }
  0xc3   :  { %v914_v31 = vsel %vm694_vm2, %v913_v28, %v909_v7  ;;  %v495_v32 = vpop.xlane.xlu1 %494  ;;  %vm1062_vm2 = vcmask 1041408  }
  0xc4   :  { %v537_v33 = vmul.f32 0.00390625, %v495_v32  ;;  %v463_v34 = vpop.xlane.xlu0 %462 }
  0xc5   :  { %v521_v35 = vmul.f32 0.00390625, %v463_v34  ;;  %v738_v34 = vadd.s32 4294967224, %v1477_v23 }
  0xc6   :  { %v814_v36 = vrot.slane %v537_v33, %v1510_v30  ;;  %v731_v33 = vadd.s32 4294967232, %v1477_v23 }
  0xc7   :  { %v714_v38 = vrot.slane %v521_v35, %v1510_v30  ;;  %v619_v39 = vpop.xlane.xlu1 %618 }
  0xc8   :  { %v815_v40 = vsel %vm715_vm5, %v814_v36, %v810_v22  ;;  %v997_v41 = vrot.slane %v619_v39, %v699_v54  ;;  %v587_v42 = vpop.xlane.xlu0 %586  ;;  %v745_v36 = vadd.s32 4294967216, %v1477_v23  ;;  %v1572_v39 = vsub.s32 %v731_v33, %v1485_v27 }
  0xc9   :  { %v716_v43 = vsel %vm715_vm5, %v714_v38, %v709_v26  ;;  %v918_v44 = vrot.slane %v587_v42, %v699_v54  ;;  %v752_v38 = vadd.s32 4294967208, %v1477_v23  ;;  %v1577_v42 = vsub.s32 %v738_v34, %v1485_v27 }
  0xca   :  { %v998_v45 = vsel %vm701_vm3, %v997_v41, %v993_v29  ;;  %v766_v41 = vadd.s32 4294967192, %v1477_v23 }
  0xcb   :  { %v919_v47 = vsel %vm701_vm3, %v918_v44, %v914_v31  ;;  %v497_v48 = vpop.xlane.xlu1 %496  ;;  %v773_v44 = vadd.s32 4294967184, %v1477_v23  ;;  %v1592_v53 = vsub.s32 %v752_v38, %v1485_v27  ;;  %vm1152_vm3 = vcmask 64512  }
  0xcc   :  { %v538_v49 = vmul.f32 0.00390625, %v497_v48  ;;  %v465_v50 = vpop.xlane.xlu0 %464 }
  0xcd   :  { %v522_v51 = vmul.f32 0.00390625, %v465_v50 }
  0xce   :  { %v819_v52 = vrot.slane %v538_v49, %v1520_v46  ;;  %v1585_v49 = vsub.s32 %v745_v36, %v1485_v27 }
  0xcf   :  { %v721_v55 = vrot.slane %v522_v51, %v1520_v46  ;;  %v621_v56 = vpop.xlane.xlu1 %620 }
  0xd0   :  { %v820_v54 = vsel %vm722_vm6, %v819_v52, %v815_v40  ;;  %v1002_v57 = vrot.slane %v621_v56, %v706_v12  ;;  %v589_v58 = vpop.xlane.xlu0 %588  ;;  %v759_v40 = vadd.s32 4294967200, %v1477_v23  ;;  %v1598_v56 = vsub.s32 %v766_v41, %v1485_v27 }
  0xd1   :  { %v723_v59 = vsel %vm722_vm6, %v721_v55, %v716_v43  ;;  %v923_v60 = vrot.slane %v589_v58, %v706_v12  ;;  %v1601_v58 = vsub.s32 %v773_v44, %v1485_v27 }
  0xd2   :  { %v1529_v61 = vsel %vm708_vm4, %v1002_v57, %v998_v45  ;;  %v780_v45 = vadd.s32 4294967176, %v1477_v23  ;;  %v1595_v23 = vsub.s32 %v759_v40, %v1485_v27 }
  0xd3   :  { %v1535_v63 = vsel %vm708_vm4, %v923_v60, %v919_v47  ;;  %v499_v0 = vpop.xlane.xlu1 %498 }
  0xd4   :  { %v539_v1 = vmul.f32 0.00390625, %v499_v0  ;;  %v467_v2 = vpop.xlane.xlu0 %466 }
  0xd5   :  { %v523_v3 = vmul.f32 0.00390625, %v467_v2 }
  0xd6   :  { %v824_v4 = vrot.slane %v539_v1, %v1532_v62 }
  0xd7   :  { %v728_v5 = vrot.slane %v523_v3, %v1532_v62  ;;  %v623_v6 = vpop.xlane.xlu1 %622 }
  0xd8   :  { %v1540_v7 = vsel %vm729_vm7, %v824_v4, %v820_v54  ;;  %v1542_v8 = vpop.xlane.xlu0 %590  ;;  %v1007_v47 = vrot.slane %v623_v6, %v1510_v30 }
  0xd9   :  { %v1545_v9 = vsel %vm729_vm7, %v728_v5, %v723_v59  ;;  %v928_v51 = vrot.slane %v1542_v8, %v1510_v30  ;;  %v1604_v59 = vsub.s32 %v780_v45, %v1485_v27 }
  0xda   :  { %v1008_v60 = vsel %vm715_vm5, %v1007_v47, %v1529_v61 }
  0xdb   :  { %v501_v10 = vpop.xlane.xlu1 %500  ;;  %v929_v4 = vsel %vm715_vm5, %v928_v51, %v1535_v63 }
  0xdc   :  { %v469_v11 = vpop.xlane.xlu0 %468  ;;  %v540_v48 = vmul.f32 0.00390625, %v501_v10 }
  0xdd   :  { %v524_v52 = vmul.f32 0.00390625, %v469_v11 }
  0xde   :  { %v829_v0 = vrot.slane %v540_v48, %v1572_v39 }
  0xdf   :  { %v1547_v12 = vpop.xlane.xlu1 %624  ;;  %v735_v5 = vrot.slane %v524_v52, %v1572_v39 }
  0xe0   :  { %v1549_v13 = vpop.xlane.xlu0 %592  ;;  %v1012_v27 = vrot.slane %v1547_v12, %v1520_v46  ;;  %v830_v63 = vsel %vm736_vm8, %v829_v0, %v1540_v7 }
  0xe1   :  { %v933_v34 = vrot.slane %v1549_v13, %v1520_v46 }
  0xe3   :  { %v503_v14 = vpop.xlane.xlu1 %502 }
  0xe4   :  { %v471_v15 = vpop.xlane.xlu0 %470  ;;  %v541_v55 = vmul.f32 0.00390625, %v503_v14 }
  0xe5   :  { %v525_v54 = vmul.f32 0.00390625, %v471_v15 }
  0xe6   :  { %v834_v10 = vrot.slane %v541_v55, %v1577_v42 }
  0xe7   :  { %v1551_v16 = vpop.xlane.xlu1 %626  ;;  %v742_v14 = vrot.slane %v525_v54, %v1577_v42 }
  0xe8   :  { %v1553_v17 = vpop.xlane.xlu0 %594  ;;  %v835_v7 = vsel %vm743_vm9, %v834_v10, %v830_v63  ;;  %v1017_v55 = vrot.slane %v1551_v16, %v1532_v62 }
  0xeb   :  { %v505_v18 = vpop.xlane.xlu1 %504 }
  0xec   :  { %v473_v19 = vpop.xlane.xlu0 %472  ;;  %v542_v57 = vmul.f32 0.00390625, %v505_v18 }
  0xed   :  { %v526_v1 = vmul.f32 0.00390625, %v473_v19 }
  0xee   :  { %v839_v15 = vrot.slane %v542_v57, %v1585_v49 }
  0xef   :  { %v1555_v20 = vpop.xlane.xlu1 %628 }
  0xf0   :  { %v1557_v21 = vpop.xlane.xlu0 %596  ;;  %v840_v44 = vsel %vm750_vm10, %v839_v15, %v835_v7 }
  0xf3   :  { %v507_v22 = vpop.xlane.xlu1 %506 }
  0xf4   :  { %v475_v24 = vpop.xlane.xlu0 %474  ;;  %v543_v2 = vmul.f32 0.00390625, %v507_v22 }
  0xf5   :  { %v527_v6 = vmul.f32 0.00390625, %v475_v24  ;;  %v749_v24 = vrot.slane %v526_v1, %v1585_v49 }
  0xf6   :  { %v844_v12 = vrot.slane %v543_v2, %v1592_v53 }
  0xf7   :  { %v1559_v25 = vpop.xlane.xlu1 %630 }
  0xf8   :  { %v1561_v26 = vpop.xlane.xlu0 %598  ;;  %v845_v47 = vsel %vm757_vm11, %v844_v12, %v840_v44 }
  0xfb   :  { %v509_v28 = vpop.xlane.xlu1 %508 }
  0xfc   :  { %v477_v29 = vpop.xlane.xlu0 %476  ;;  %v544_v8 = vmul.f32 0.00390625, %v509_v28 }
  0xfd   :  { %v528_v61 = vmul.f32 0.00390625, %v477_v29  ;;  %v737_v29 = vsel %vm736_vm8, %v735_v5, %v1545_v9 }
  0xfe   :  { %v849_v36 = vrot.slane %v544_v8, %v1595_v23  ;;  %v744_v41 = vsel %vm743_vm9, %v742_v14, %v737_v29 }
  0xff   :  { %v1563_v31 = vpop.xlane.xlu1 %632  ;;  %v763_v38 = vrot.slane %v528_v61, %v1595_v23  ;;  %v751_v45 = vsel %vm750_vm10, %v749_v24, %v744_v41 }
 0x100   :  { %v1565_v32 = vpop.xlane.xlu0 %600  ;;  %v850_v57 = vsel %vm764_vm12, %v849_v36, %v845_v47  ;;  %v1032_v14 = vrot.slane %v1563_v31, %v1585_v49 }
 0x103   :  { %v511_v35 = vpop.xlane.xlu1 %510 }
 0x104   :  { %v479_v37 = vpop.xlane.xlu0 %478  ;;  %v545_v11 = vmul.f32 0.00390625, %v511_v35  ;;  %v756_v35 = vrot.slane %v527_v6, %v1592_v53 }
 0x105   :  { %v529_v18 = vmul.f32 0.00390625, %v479_v37  ;;  %v1013_v37 = vsel %vm722_vm6, %v1012_v27, %v1008_v60  ;;  %v938_v60 = vrot.slane %v1553_v17, %v1532_v62  ;;  %v943_v27 = vrot.slane %v1557_v21, %v1572_v39 }
 0x106   :  { %v854_v40 = vrot.slane %v545_v11, %v1598_v56  ;;  %v758_v54 = vsel %vm757_vm11, %v756_v35, %v751_v45  ;;  %v1027_v62 = vrot.slane %v1559_v25, %v1577_v42  ;;  %v948_v11 = vrot.slane %v1561_v26, %v1577_v42  ;;  %v1151_v45 = vld [vmem:[%s1720_s2] sm:$0xff]  ;;  %s1370_s2 = scalar_lea.vmem %s1244_s4, 32 }
 0x107   :  { %v1579_v43 = vpop.xlane.xlu1 %634  ;;  %v770_v9 = vrot.slane %v529_v18, %v1598_v56  ;;  %v765_v0 = vsel %vm764_vm12, %v763_v38, %v758_v54  ;;  %v1018_v21 = vsel %vm729_vm7, %v1017_v55, %v1013_v37  ;;  %v953_v25 = vrot.slane %v1565_v32, %v1585_v49  ;;  %1309 = vmatpush3.msra.mxu1 %v1151_v45  ;;  %p1371_p8 = scmp.ne.s32.totalorder %s1244_s4, %s1370_s2  ;;  %p1376_p10 = scmp.lt.s32.totalorder %s1370_s2, %s1370_s2 }
 0x108   :  { %v1587_v50 = vpop.xlane.xlu0 %602  ;;  %v855_v1 = vsel %vm771_vm13, %v854_v40, %v850_v57 }
 0x109   :  { %v772_v5 = vsel %vm771_vm13, %v770_v9, %v765_v0  ;;  %v958_v26 = vrot.slane %v1587_v50, %v1592_v53  ;;  %p1377_p11 = por %p1376_p10, %p1375_p9 }
 0x10b   :  { %v513_v30 = vpop.xlane.xlu1 %512  ;;  %p1378_p12 = pnand %p1377_p11, %p1371_p8 }
 0x10c   :  { %v481_v3 = vpop.xlane.xlu0 %480  ;;  %v546_v19 = vmul.f32 0.00390625, %v513_v30 }
 0x10d   :  { %v530_v28 = vmul.f32 0.00390625, %v481_v3  ;;  %v1022_v3 = vrot.slane %v1555_v20, %v1572_v39  ;;  %v934_v20 = vsel %vm722_vm6, %v933_v34, %v929_v4  ;;  %v1037_v39 = vrot.slane %v1579_v43, %v1592_v53 }
 0x10e   :  { %v859_v46 = vrot.slane %v546_v19, %v1601_v58  ;;  %v939_v4 = vsel %vm729_vm7, %v938_v60, %v934_v20 }
 0x10f   :  { %v1617_v22 = vpop.xlane.xlu1 %636  ;;  %v777_v48 = vrot.slane %v530_v28, %v1601_v58  ;;  %v1023_v19 = vsel %vm736_vm8, %v1022_v3, %v1018_v21  ;;  %v944_v63 = vsel %vm736_vm8, %v943_v27, %v939_v4 }
 0x110   :  { %v1623_v33 = vpop.xlane.xlu0 %604  ;;  %v860_v16 = vsel %vm778_vm14, %v859_v46, %v855_v1  ;;  %v1042_v31 = vrot.slane %v1617_v22, %v1595_v23  ;;  %v1028_v32 = vsel %vm743_vm9, %v1027_v62, %v1023_v19  ;;  %v949_v12 = vsel %vm743_vm9, %v948_v11, %v944_v63 }
 0x111   :  { %v779_v17 = vsel %vm778_vm14, %v777_v48, %v772_v5  ;;  %v963_v43 = vrot.slane %v1623_v33, %v1595_v23  ;;  %v1033_v28 = vsel %vm750_vm10, %v1032_v14, %v1028_v32  ;;  %v954_v22 = vsel %vm750_vm10, %v953_v25, %v949_v12 }
 0x112   :  { %v1038_v29 = vsel %vm757_vm11, %v1037_v39, %v1033_v28  ;;  %v959_v35 = vsel %vm757_vm11, %v958_v26, %v954_v22 }
 0x113   :  { %v515_v13 = vpop.xlane.xlu1 %514  ;;  %v1043_v23 = vsel %vm764_vm12, %v1042_v31, %v1038_v29  ;;  %v964_v36 = vsel %vm764_vm12, %v963_v43, %v959_v35 }
 0x114   :  { %v547_v51 = vmul.f32 0.00390625, %v515_v13  ;;  %v483_v52 = vpop.xlane.xlu0 %482 }
 0x115   :  { %v531_v30 = vmul.f32 0.00390625, %v483_v52 }
 0x116   :  { %v864_v2 = vrot.slane %v547_v51, %v1604_v59 }
 0x117   :  { %v784_v6 = vrot.slane %v531_v30, %v1604_v59  ;;  %v639_v8 = vpop.xlane.xlu1 %638 }
 0x118   :  { %v607_v10 = vpop.xlane.xlu0 %606  ;;  %v865_v61 = vsel %vm785_vm15, %v864_v2, %v860_v16  ;;  %v1047_v49 = vrot.slane %v639_v8, %v1598_v56 }
 0x119   :  { %v786_v15 = vsel %vm785_vm15, %v784_v6, %v779_v17  ;;  %v968_v50 = vrot.slane %v607_v10, %v1598_v56 }
 0x11a   :  { %v867_v18 = vsel %vm866_vm0, %v865_v61, %v786_v15  ;;  %v1048_v37 = vsel %vm771_vm13, %v1047_v49, %v1043_v23 }
 0x11b   :  { %v641_v42 = vpop.xlane.xlu1 %640  ;;  %v969_v38 = vsel %vm771_vm13, %v968_v50, %v964_v36 }
 0x11c   :  { %v609_v24 = vpop.xlane.xlu0 %608  ;;  %v1052_v53 = vrot.slane %v641_v42, %v1601_v58 }
 0x11d   :  { %v973_v34 = vrot.slane %v609_v24, %v1601_v58 }
 0x11e   :  { %v1053_v40 = vsel %vm778_vm14, %v1052_v53, %v1048_v37 }
 0x11f   :  { %v643_v33 = vpop.xlane.xlu1 %642  ;;  %v974_v58 = vsel %vm778_vm14, %v973_v34, %v969_v38 }
 0x120   :  { %v1057_v7 = vrot.slane %v643_v33, %v1604_v59  ;;  %v611_v56 = vpop.xlane.xlu0 %610 }
 0x121   :  { %v978_v41 = vrot.slane %v611_v56, %v1604_v59 }
 0x122   :  { %v1058_v44 = vsel %vm785_vm15, %v1057_v7, %v1053_v40 }
 0x123   :  { %v979_v9 = vsel %vm785_vm15, %v978_v41, %v974_v58 }
 0x124   :  { %v1060_v46 = vsel %vm1059_vm1, %v1058_v44, %v979_v9 }
 0x125   :  { %v1063_v13 = vsel %vm1062_vm2, %v867_v18, %v1060_v46 }
 0x126   :  { %1306 = vmatmul.mubr.f32.vlgmr.msra.gmra.mrb[0].mxu0 %v1063_v13 }
 0x1f9   :  { %v1146_v47 = vpop.f32.mrb[0].mxu0 }
 0x1fa   :  { %v1150_v48 = vmax.f32 %v1146_v47, 0.0  ;;  %v1307_v59 = vpop.f32.mrb[1].mxu0 }
 0x1fc   :  { %1311 = vmatmul.mubr.msk.f32.vlgmr.msra.gmra.mrb[0].mxu1 %vm1152_vm3, %v1150_v48 }
 0x2cf   :  { %v1222_v51 = vpop.f32.mrb[0].mxu1 }
 0x2d0   :  { %v1227_v52 = vrot.slane %v1222_v51, 2  ;;  %v1312_v55 = vpop.f32.mrb[1].mxu1 }
 0x2d2   :  { %v1229_v54 = vadd.f32 %v1227_v52, %v1222_v51 }
 0x2d4   :  { %v1253_v57 = vmul.f32 -1.442695, %v1229_v54 }
 0x2d6   :  { %1344 = vpow2.f32 %v1253_v57 }
 0x2e0   :  { %v1345_v30 = vpop.eup %1344 }
 0x2e1   :  { %v1233_v60 = vadd.f32 1.0, %v1345_v30 }
 0x2e3   :  { %1346 = vrcp.f32 %v1233_v60 }
 0x2ed   :  { %v1347_v0 = vpop.eup %1346 }
 0x2ee   :  { %1236 = vst [vmem:[#allocation7] sm:$0x3] %v1347_v0 }
 0x2ef   :  { %1381 = shalt.err (!%p1378_p12)
}
 0x2f0   :  { %s1382_s7 = scalar_lea.hbm %s1721_s3, 32 }
 0x2f1   :  { %p1383_p13 = scmp.ne.s32.totalorder %s1721_s3, %s1382_s7  ;;  %p1386_p0 = scmp.lt.u32.totalorder %s1382_s7, %s1721_s3 }
 0x2f3   :  { %p1388_p1 = pnand %p1386_p0, %p1383_p13 }
 0x2f5   :  { %1391 = shalt.err (!%p1388_p1)
}
 0x2f6   :  { %1246 = dma.vmem_to_hbm [thread:$0]  %s1244_s4, 32, %s1721_s3, [#allocation6]  }
 0x2f7   :  { %1394 = dma.done.wait [#allocation6], 32  }
 0x2f8   :  { %1395 = vsyncadd [#allocation6], 4294967264 }
 0x2f9   :  { %1250 = vsyncpa [#allocation5], 1 }
 0x2fa   :  { %1251 = vsyncpa [#allocation6], 1 }

</bundles_post_ra>
